<compile_context>
chip_gen: v7x
topology: tpu7x:2x2x1
jax: 0.10.0
libtpu: 0.0.40
codegen_flags: <defaults>
</compile_context>

<pallas_src>
import math

import jax
import jax.numpy as jnp
from jax.experimental import pallas as pl
from jax.experimental.pallas import tpu as pltpu

# ----------------------------- config ---------------------------------------
BATCH = 2
SEQ = 8
INPUT_DIM = 32            # config.input_dim (hidden size)
NUM_HEADS = 4             # config.num_heads
HEAD_DIM = INPUT_DIM // NUM_HEADS
VOCAB = 64
NUM_KEYWORD_CLASSES = 2   # KeywordDetectionHead -> per-token 2-class logits
NUM_HEAD_OUTPUTS = NUM_KEYWORD_CLASSES + 1 + 1   # kw(2) | trend(1) | comp(1)
OUT_W = 64                # packed output lanes: ctx(32) | attnw(8) | heads(4) | pad(20)


# ----------------------------- kernel ---------------------------------------
def _model_kernel(ids_ref, neg_ref, w_ref, out_ref):
    """Fused (embedding->QKV) lookup + MHA (key padding mask) + fused heads.

    ids_ref : (B*S, 1)   int32 token ids
    neg_ref : (B*H, S)   additive key-padding mask (0 for valid, -1e30 padded)
    w_ref   : (V+D+1, 3D) f32 weight slab:
                rows [0:V)      -> emb @ w_qkv + b_qkv (q columns pre-scaled)
                rows [V:V+D)    -> [wo | wo @ w_heads]           (cols 0:D+4)
                row  V+D        -> [bo | bo @ w_heads + b_heads] (cols 0:D+4)
    out_ref : (B*S, OUT_W) f32 packed output.
    """
    B, S, D = BATCH, SEQ, INPUT_DIM
    H, Hd = NUM_HEADS, HEAD_DIM
    BS = B * S
    V = VOCAB
    NH = NUM_HEAD_OUTPUTS

    # --- backbone stand-in + QKV: one-hot x (V, 3D) matmul (MXU) -------------
    # TODO(synk): out-of-range ids silently map to a zero embedding row.
    ids = ids_ref[...]                                                # (BS, 1)
    vocab_iota = jax.lax.broadcasted_iota(jnp.int32, (BS, V), 1)
    onehot = (ids == vocab_iota).astype(jnp.float32)                  # (BS, V)
    qkv = jnp.dot(onehot, w_ref[0:V, :],
                  preferred_element_type=jnp.float32)                 # (BS, 3D)

    # --- head-major (B*H, S, Hd) layout: 2 batched matmuls instead of 16 ----
    q4 = qkv[:, 0:D].reshape(B, S, H, Hd)         # softmax scale already folded
    k4 = qkv[:, D:2 * D].reshape(B, S, H, Hd)
    v4 = qkv[:, 2 * D:3 * D].reshape(B, S, H, Hd)
    qbh = jnp.swapaxes(q4, 1, 2).reshape(B * H, S, Hd)
    kbh = jnp.swapaxes(k4, 1, 2).reshape(B * H, S, Hd)
    vbh = jnp.swapaxes(v4, 1, 2).reshape(B * H, S, Hd)

    # scores + key_padding_mask (~attention_mask.bool() -> -1e30 on padded keys)
    s = jnp.einsum("bqd,bkd->bqk", qbh, kbh,
                   preferred_element_type=jnp.float32)                # (BH, S, S)
    s = s + neg_ref[...][:, None, :]

    # numerically-stable softmax; EUP reciprocal seed + one Newton step
    m = jnp.max(s, axis=-1, keepdims=True)
    p = jnp.exp(s - m)
    l = jnp.sum(p, axis=-1, keepdims=True)
    r = pl.reciprocal(l, approx=True)
    r = r * (2.0 - l * r)                       # refine -> exact softmax rows
    p = p * r                                                         # (BH, S, S)
    # NOTE: a fully padded row yields uniform weights instead of PyTorch NaNs.

    # nn.MultiheadAttention returns head-averaged attention weights by default
    attnw = (jnp.sum(p.reshape(B, H, S, S), axis=1) * (1.0 / H)).reshape(BS, S)

    # P @ V (batched) and back to (BS, D)
    o = jnp.einsum("bqk,bkd->bqd", p, vbh,
                   preferred_element_type=jnp.float32)                # (BH, S, Hd)
    attn2d = jnp.swapaxes(o.reshape(B, H, S, Hd), 1, 2).reshape(BS, D)

    # --- fused out-projection + analysis heads: one (BS,D) x (D,D+4) matmul --
    w_out = w_ref[V:V + D, 0:D + NH]                                  # (D, D+4)
    b_out = w_ref[V + D:V + D + 1, 0:D + NH]                          # (1, D+4)
    ctx_heads = jnp.dot(attn2d, w_out,
                        preferred_element_type=jnp.float32) + b_out   # (BS, D+4)

    heads = ctx_heads[:, D:D + NH]                # kw(2) | trend(1) | comp(1)
    col = jax.lax.broadcasted_iota(jnp.int32, heads.shape, 1)
    heads = jnp.where(col >= NUM_KEYWORD_CLASSES, jax.nn.sigmoid(heads), heads)

    # --- single lane-dense packed output slab --------------------------------
    out_ref[:, 0:D] = ctx_heads[:, 0:D]                               # context
    out_ref[:, D:D + S] = attnw                                       # attn weights
    out_ref[:, D + S:D + S + NH] = heads                              # head outputs
    out_ref[:, D + S + NH:] = jnp.zeros((BS, OUT_W - (D + S + NH)), jnp.float32)


# ----------------------------- params ----------------------------------------
def init_params(key):
    ks = jax.random.split(key, 15)
    D, V = INPUT_DIM, VOCAB
    w, b = 0.1, 0.1

    def rnd(i, shape, s):
        return jax.random.normal(ks[i], shape, jnp.float32) * s

    return {
        "emb": rnd(0, (V, D), 1.0),
        "wq": rnd(1, (D, D), w), "bq": rnd(2, (1, D), b),
        "wk": rnd(3, (D, D), w), "bk": rnd(4, (1, D), b),
        "wv": rnd(5, (D, D), w), "bv": rnd(6, (1, D), b),
        "wo": rnd(7, (D, D), w), "bo": rnd(8, (1, D), b),
        # TODO(synk): analysis heads modeled as single linear layers.
        "w_kw": rnd(9, (D, NUM_KEYWORD_CLASSES), w), "b_kw": rnd(10, (1, NUM_KEYWORD_CLASSES), b),
        "w_tr": rnd(11, (D, 1), w), "b_tr": rnd(12, (1, 1), b),
        "w_cp": rnd(13, (D, 1), w), "b_cp": rnd(14, (1, 1), b),
    }


def pack_params(params):
    """Host-side weight folding into a single (V+D+1, 3D) slab."""
    D, V, NH = INPUT_DIM, VOCAB, NUM_HEAD_OUTPUTS
    scale = 1.0 / math.sqrt(HEAD_DIM)
    # fold softmax scale into the Q columns, then fold emb through QKV
    w_qkv = jnp.concatenate([params["wq"] * scale, params["wk"], params["wv"]], axis=1)
    b_qkv = jnp.concatenate([params["bq"] * scale, params["bk"], params["bv"]], axis=1)
    emb_qkv = params["emb"] @ w_qkv + b_qkv                                   # (V, 3D)
    # fold out-projection through the three analysis heads
    w_heads = jnp.concatenate([params["w_kw"], params["w_tr"], params["w_cp"]], axis=1)  # (D, 4)
    b_heads = jnp.concatenate([params["b_kw"], params["b_tr"], params["b_cp"]], axis=1)  # (1, 4)
    w_out = jnp.concatenate([params["wo"], params["wo"] @ w_heads], axis=1)              # (D, D+4)
    b_out = jnp.concatenate([params["bo"], params["bo"] @ w_heads + b_heads], axis=1)    # (1, D+4)

    slab = jnp.zeros((V + D + 1, 3 * D), jnp.float32)
    slab = slab.at[0:V, :].set(emb_qkv)
    slab = slab.at[V:V + D, 0:D + NH].set(w_out)
    slab = slab.at[V + D, 0:D + NH].set(b_out[0])
    return slab


# ----------------------------- wrapper ---------------------------------------
@jax.jit
def keyword_extractor_forward(weight_slab, input_ids, attention_mask):
    B, S, D, H = BATCH, SEQ, INPUT_DIM, NUM_HEADS

    ids2d = input_ids.reshape(B * S, 1).astype(jnp.int32)
    mask = attention_mask.astype(jnp.float32)                                 # (B, S)
    neg = (1.0 - mask) * (-1e30)                                              # (B, S)
    neg_bh = jnp.broadcast_to(neg[:, None, :], (B, H, S)).reshape(B * H, S)   # (BH, S)

    vmem = pl.BlockSpec(memory_space=pltpu.MemorySpace.VMEM)
    packed = pl.pallas_call(
        _model_kernel,
        out_shape=jax.ShapeDtypeStruct((B * S, OUT_W), jnp.float32),
        in_specs=[vmem, vmem, vmem],
        out_specs=vmem,
    )(ids2d, neg_bh, weight_slab)

    ctx = packed[:, 0:D].reshape(B, S, D)
    attn_w = packed[:, D:D + S].reshape(B, S, S)
    heads = packed[:, D + S:D + S + NUM_HEAD_OUTPUTS]
    kw = heads[:, 0:NUM_KEYWORD_CLASSES].reshape(B, S, NUM_KEYWORD_CLASSES)
    trend = heads[:, NUM_KEYWORD_CLASSES:NUM_KEYWORD_CLASSES + 1].reshape(B, S, 1)
    comp = heads[:, NUM_KEYWORD_CLASSES + 1:NUM_HEAD_OUTPUTS].reshape(B, S, 1)

    return {
        "keyword_logits": kw,
        "trend_scores": trend,
        "competition_scores": comp,
        "attention_weights": attn_w,
        "context_embeddings": ctx,
    }


# ----------------------------- pure-JAX reference -----------------------------
def reference_forward(params, input_ids, attention_mask):
    B, S, D, H, Hd = BATCH, SEQ, INPUT_DIM, NUM_HEADS, HEAD_DIM
    x = params["emb"][input_ids]                                              # (B, S, D)
    mask = attention_mask.astype(jnp.float32)

    q = (x @ params["wq"] + params["bq"]).reshape(B, S, H, Hd)
    k = (x @ params["wk"] + params["bk"]).reshape(B, S, H, Hd)
    v = (x @ params["wv"] + params["bv"]).reshape(B, S, H, Hd)

    scores = jnp.einsum("bqhd,bkhd->bhqk", q, k) / math.sqrt(Hd)
    scores = scores + ((1.0 - mask) * (-1e30))[:, None, None, :]
    p = jax.nn.softmax(scores, axis=-1)
    attn_w = jnp.mean(p, axis=1)
    attn_out = jnp.einsum("bhqk,bkhd->bqhd", p, v).reshape(B, S, D)
    ctx = attn_out @ params["wo"] + params["bo"]

    return {
        "keyword_logits": ctx @ params["w_kw"] + params["b_kw"],
        "trend_scores": jax.nn.sigmoid(ctx @ params["w_tr"] + params["b_tr"]),
        "competition_scores": jax.nn.sigmoid(ctx @ params["w_cp"] + params["b_cp"]),
        "attention_weights": attn_w,
        "context_embeddings": ctx,
    }


# ----------------------------- main ------------------------------------------
if __name__ == "__main__":
    key = jax.random.PRNGKey(0)
    pkey, dkey = jax.random.split(key)

    params = init_params(pkey)
    weight_slab = pack_params(params)

    input_ids = jax.random.randint(dkey, (BATCH, SEQ), 0, VOCAB, dtype=jnp.int32)
    # second sequence has 2 padding tokens at the end
    attention_mask = jnp.array(
        [[1] * SEQ,
         [1] * (SEQ - 2) + [0] * 2],
        dtype=jnp.int32,
    )

    outs = keyword_extractor_forward(weight_slab, input_ids, attention_mask)
    jax.block_until_ready(outs)

    # shape checks
    assert outs["context_embeddings"].shape == (BATCH, SEQ, INPUT_DIM)
    assert outs["attention_weights"].shape == (BATCH, SEQ, SEQ)
    assert outs["keyword_logits"].shape == (BATCH, SEQ, NUM_KEYWORD_CLASSES)
    assert outs["trend_scores"].shape == (BATCH, SEQ, 1)
    assert outs["competition_scores"].shape == (BATCH, SEQ, 1)

    # attention rows sum to ~1 and padded keys get ~0 weight
    row_sums = jnp.sum(outs["attention_weights"], axis=-1)
    assert jnp.allclose(row_sums, 1.0, atol=2e-3)
    assert float(jnp.max(outs["attention_weights"][1, :, SEQ - 2:])) < 1e-6

    # numerical parity with the pure-JAX reference
    ref = reference_forward(params, input_ids, attention_mask)
    for name in ("context_embeddings", "attention_weights", "keyword_logits",
                 "trend_scores", "competition_scores"):
        err = float(jnp.max(jnp.abs(outs[name] - ref[name])))
        assert err < 5e-3, f"{name} mismatch: {err}"

    print("KERNEL_OK")
</pallas_src>

<mosaic_0001>
module attributes {stable_mosaic.version = 11 : i64} {
  func.func @_model_kernel(%arg0: memref<16x1xi32, #tpu.memory_space<vmem>>, %arg1: memref<8x8xf32, #tpu.memory_space<vmem>>, %arg2: memref<97x96xf32, #tpu.memory_space<vmem>>, %arg3: memref<16x64xf32, #tpu.memory_space<vmem>>) attributes {dimension_semantics = [], scalar_prefetch = 0 : i64, scratch_operands = 0 : i64, tpu.core_type = #tpu.core_type<tc>} {
    %c0 = arith.constant 0 : index
    %c0_0 = arith.constant 0 : index
    %0 = vector.load %arg0[%c0, %c0_0] : memref<16x1xi32, #tpu.memory_space<vmem>>, vector<16x1xi32>
    %1 = tpu.iota {dimensions = array<i32: 1>} : vector<16x64xi32>
    %2 = vector.broadcast %0 : vector<16x1xi32> to vector<16x64xi32>
    %3 = arith.cmpi eq, %2, %1 : vector<16x64xi32>
    %4 = arith.extui %3 : vector<16x64xi1> to vector<16x64xi32>
    %5 = arith.sitofp %4 : vector<16x64xi32> to vector<16x64xf32>
    %c0_1 = arith.constant 0 : index
    %c0_2 = arith.constant 0 : index
    %6 = vector.load %arg2[%c0_1, %c0_2] : memref<97x96xf32, #tpu.memory_space<vmem>>, vector<64x96xf32>
    %cst = arith.constant dense<0.000000e+00> : vector<16x96xf32>
    %7 = tpu.matmul %5, %6, %cst {dimension_numbers = #tpu.dot_dimension_numbers<[1], [0], [0], [1], [0, 0, 1, 1], [], []>} : vector<16x64xf32>, vector<64x96xf32>, vector<16x96xf32> -> vector<16x96xf32>
    %8 = vector.extract_strided_slice %7 {offsets = [0, 0], sizes = [16, 32], strides = [1, 1]} : vector<16x96xf32> to vector<16x32xf32>
    %9 = vector.shape_cast %8 : vector<16x32xf32> to vector<2x8x4x8xf32>
    %10 = vector.extract_strided_slice %7 {offsets = [0, 32], sizes = [16, 32], strides = [1, 1]} : vector<16x96xf32> to vector<16x32xf32>
    %11 = vector.shape_cast %10 : vector<16x32xf32> to vector<2x8x4x8xf32>
    %12 = vector.extract_strided_slice %7 {offsets = [0, 64], sizes = [16, 32], strides = [1, 1]} : vector<16x96xf32> to vector<16x32xf32>
    %13 = vector.shape_cast %12 : vector<16x32xf32> to vector<2x8x4x8xf32>
    %14 = tpu.transpose %9, [0, 2, 1, 3] : vector<2x8x4x8xf32> -> vector<2x4x8x8xf32>
    %15 = vector.shape_cast %14 : vector<2x4x8x8xf32> to vector<8x8x8xf32>
    %16 = tpu.transpose %11, [0, 2, 1, 3] : vector<2x8x4x8xf32> -> vector<2x4x8x8xf32>
    %17 = vector.shape_cast %16 : vector<2x4x8x8xf32> to vector<8x8x8xf32>
    %18 = tpu.transpose %13, [0, 2, 1, 3] : vector<2x8x4x8xf32> -> vector<2x4x8x8xf32>
    %19 = vector.shape_cast %18 : vector<2x4x8x8xf32> to vector<8x8x8xf32>
    "tpu.trace_start"() <{level = 10 : i32, message = "bqd,bkd->bqk"}> : () -> ()
    %cst_3 = arith.constant dense<0.000000e+00> : vector<8x8x8xf32>
    %20 = tpu.matmul %15, %17, %cst_3 {dimension_numbers = #tpu.dot_dimension_numbers<[2], [2], [1], [1], [0, 0, 0, 1, 1, 1], [0], [0]>} : vector<8x8x8xf32>, vector<8x8x8xf32>, vector<8x8x8xf32> -> vector<8x8x8xf32>
    "tpu.trace_stop"() : () -> ()
    %c0_4 = arith.constant 0 : index
    %c0_5 = arith.constant 0 : index
    %21 = vector.load %arg1[%c0_4, %c0_5] : memref<8x8xf32, #tpu.memory_space<vmem>>, vector<8x8xf32>
    %22 = vector.shape_cast %21 : vector<8x8xf32> to vector<8x1x8xf32>
    %23 = vector.broadcast %22 : vector<8x1x8xf32> to vector<8x8x8xf32>
    %24 = arith.addf %20, %23 : vector<8x8x8xf32>
    %cst_6 = arith.constant dense<0xFF800000> : vector<8x8xf32>
    %25 = vector.multi_reduction <maximumf>, %24, %cst_6 [2] : vector<8x8x8xf32> to vector<8x8xf32>
    %26 = vector.shape_cast %25 : vector<8x8xf32> to vector<8x8x1xf32>
    %27 = vector.broadcast %26 : vector<8x8x1xf32> to vector<8x8x8xf32>
    %28 = arith.subf %24, %27 : vector<8x8x8xf32>
    %29 = math.exp %28 : vector<8x8x8xf32>
    %cst_7 = arith.constant dense<0.000000e+00> : vector<8x8xf32>
    %30 = vector.multi_reduction <add>, %29, %cst_7 [2] : vector<8x8x8xf32> to vector<8x8xf32>
    %31 = vector.shape_cast %30 : vector<8x8xf32> to vector<8x8x1xf32>
    %32 = tpu.reciprocal %31 {approx = true} : vector<8x8x1xf32> -> vector<8x8x1xf32>
    %33 = arith.mulf %31, %32 : vector<8x8x1xf32>
    %cst_8 = arith.constant 2.000000e+00 : f32
    %34 = vector.broadcast %cst_8 : f32 to vector<8x8x1xf32>
    %35 = arith.subf %34, %33 : vector<8x8x1xf32>
    %36 = arith.mulf %32, %35 : vector<8x8x1xf32>
    %37 = vector.broadcast %36 : vector<8x8x1xf32> to vector<8x8x8xf32>
    %38 = arith.mulf %29, %37 : vector<8x8x8xf32>
    %39 = vector.shape_cast %38 : vector<8x8x8xf32> to vector<2x4x8x8xf32>
    %cst_9 = arith.constant dense<0.000000e+00> : vector<2x8x8xf32>
    %40 = vector.multi_reduction <add>, %39, %cst_9 [1] : vector<2x4x8x8xf32> to vector<2x8x8xf32>
    %cst_10 = arith.constant 2.500000e-01 : f32
    %41 = vector.broadcast %cst_10 : f32 to vector<2x8x8xf32>
    %42 = arith.mulf %40, %41 : vector<2x8x8xf32>
    %43 = vector.shape_cast %42 : vector<2x8x8xf32> to vector<16x8xf32>
    "tpu.trace_start"() <{level = 10 : i32, message = "bqk,bkd->bqd"}> : () -> ()
    %cst_11 = arith.constant dense<0.000000e+00> : vector<8x8x8xf32>
    %44 = tpu.matmul %38, %19, %cst_11 {dimension_numbers = #tpu.dot_dimension_numbers<[2], [1], [1], [2], [0, 0, 0, 1, 1, 2], [0], [0]>} : vector<8x8x8xf32>, vector<8x8x8xf32>, vector<8x8x8xf32> -> vector<8x8x8xf32>
    "tpu.trace_stop"() : () -> ()
    %45 = vector.shape_cast %44 : vector<8x8x8xf32> to vector<2x4x8x8xf32>
    %46 = tpu.transpose %45, [0, 2, 1, 3] : vector<2x4x8x8xf32> -> vector<2x8x4x8xf32>
    %47 = vector.shape_cast %46 : vector<2x8x4x8xf32> to vector<16x32xf32>
    %c64 = arith.constant 64 : index
    %c0_12 = arith.constant 0 : index
    %48 = vector.load %arg2[%c64, %c0_12] : memref<97x96xf32, #tpu.memory_space<vmem>>, vector<32x36xf32>
    %c96 = arith.constant 96 : index
    %c0_13 = arith.constant 0 : index
    %49 = vector.load %arg2[%c96, %c0_13] : memref<97x96xf32, #tpu.memory_space<vmem>>, vector<1x36xf32>
    %cst_14 = arith.constant dense<0.000000e+00> : vector<16x36xf32>
    %50 = tpu.matmul %47, %48, %cst_14 {dimension_numbers = #tpu.dot_dimension_numbers<[1], [0], [0], [1], [0, 0, 1, 1], [], []>} : vector<16x32xf32>, vector<32x36xf32>, vector<16x36xf32> -> vector<16x36xf32>
    %51 = vector.broadcast %49 : vector<1x36xf32> to vector<16x36xf32>
    %52 = arith.addf %50, %51 : vector<16x36xf32>
    %53 = vector.extract_strided_slice %52 {offsets = [0, 32], sizes = [16, 4], strides = [1, 1]} : vector<16x36xf32> to vector<16x4xf32>
    %54 = tpu.iota {dimensions = array<i32: 1>} : vector<16x4xi32>
    %c2_i32 = arith.constant 2 : i32
    %55 = vector.broadcast %c2_i32 : i32 to vector<16x4xi32>
    %56 = arith.cmpi sge, %54, %55 : vector<16x4xi32>
    %57 = arith.negf %53 : vector<16x4xf32>
    %58 = math.exp %57 : vector<16x4xf32>
    %cst_15 = arith.constant 1.000000e+00 : f32
    %59 = vector.broadcast %cst_15 : f32 to vector<16x4xf32>
    %60 = arith.addf %59, %58 : vector<16x4xf32>
    %61 = arith.divf %59, %60 : vector<16x4xf32>
    %62 = arith.select %56, %61, %53 : vector<16x4xi1>, vector<16x4xf32>
    %63 = vector.extract_strided_slice %52 {offsets = [0, 0], sizes = [16, 32], strides = [1, 1]} : vector<16x36xf32> to vector<16x32xf32>
    %c0_16 = arith.constant 0 : index
    %c0_17 = arith.constant 0 : index
    %64 = vector.load %arg3[%c0_16, %c0_17] : memref<16x64xf32, #tpu.memory_space<vmem>>, vector<16x32xf32>
    tpu.vector_store %arg3[%c0_16, %c0_17], %63 {strides = array<i32>} : memref<16x64xf32, #tpu.memory_space<vmem>>, vector<16x32xf32>,
    %c0_18 = arith.constant 0 : index
    %c32 = arith.constant 32 : index
    %65 = vector.load %arg3[%c0_18, %c32] : memref<16x64xf32, #tpu.memory_space<vmem>>, vector<16x8xf32>
    tpu.vector_store %arg3[%c0_18, %c32], %43 {strides = array<i32>} : memref<16x64xf32, #tpu.memory_space<vmem>>, vector<16x8xf32>,
    %c0_19 = arith.constant 0 : index
    %c40 = arith.constant 40 : index
    %66 = vector.load %arg3[%c0_19, %c40] : memref<16x64xf32, #tpu.memory_space<vmem>>, vector<16x4xf32>
    tpu.vector_store %arg3[%c0_19, %c40], %62 {strides = array<i32>} : memref<16x64xf32, #tpu.memory_space<vmem>>, vector<16x4xf32>,
    %cst_20 = arith.constant 0.000000e+00 : f32
    %67 = vector.broadcast %cst_20 : f32 to vector<16x20xf32>
    %c0_21 = arith.constant 0 : index
    %c44 = arith.constant 44 : index
    %68 = vector.load %arg3[%c0_21, %c44] : memref<16x64xf32, #tpu.memory_space<vmem>>, vector<16x20xf32>
    tpu.vector_store %arg3[%c0_21, %c44], %67 {strides = array<i32>} : memref<16x64xf32, #tpu.memory_space<vmem>>, vector<16x20xf32>,
    return
  }
}

</mosaic_0001>

<bundles_post_ra>
// kernel: keyword_extractor_forward.1
= control target key start
LH: loop header
LB: loop body
LE: loop exit
PB: predicated region body
PF: predicated region fallthrough
CT: control target
= control target key end

     0   :  { %v3162_v0 = vmov 0   ;;  %v3163_v9 = vmov 0.0   ;;  %v16_v16 = vlaneseq  ;;  %vm38_vm0 = vcmask 523264   ;;  %s3164_s4 = smov 104   ;;  %s3165_s5 = smov 120   ;;  %s3691_s0 = inlined_call_operand.vmem [shape: s32[16,1], index: 0, kind: input, shape index: {}]   ;;  %s3692_s2 = inlined_call_operand.vmem [shape: f32[97,96], index: 2, kind: input, shape index: {}]   ;;  %s3693_s1 = inlined_call_operand.vmem [shape: f32[8,8], index: 1, kind: input, shape index: {}]   ;;  %s3694_s3 = inlined_call_operand.vmem [shape: f32[16,64], index: 3, kind: output, shape index: {}]  }
   0x1   :  { %3120 = vset.pattern.permute.xlu0 %v3162_v0  ;;  %v14_v1 = vld [vmem:[%s3691_s0] sm:$0xff]  ;;  %v31_v3 = vld [vmem:[%s3692_s2 + $0x8] sm:$0xff]  ;;  %v32_v4 = vld [vmem:[%s3692_s2 + $0x10] sm:$0xff]  ;;  %2989 = vmatprep.subr.mxu1 %v3163_v9  ;;  %s3166_s6 = smov 112   ;;  %s3167_s7 = smov 96   ;;  %vm3168_vm3 = vmmov 0  }
   0x2   :  { %v30_v2 = vld [vmem:[%s3692_s2] sm:$0xff]  ;;  %19 = vperm.xlu0 %3120, %v14_v1   ;;  %v33_v5 = vld [vmem:[%s3692_s2 + $0x18] sm:$0xff]  ;;  %v15_v6 = vld [vmem:[%s3691_s0 + $0x8] sm:$0xff]  ;;  %v3230_v17 = vand.u32 127, %v16_v16  ;;  %2991 = vmatprep.mubr.msk.f32.mxu1 %vm3168_vm3, %v3163_v9  ;;  %s3169_s8 = smov 64   ;;  %v3273_v33 = vshrl.u32 %v16_v16, 7 }
   0x3   :  { %v3080_v7 = vpack.c.bf16 %v31_v3, %v30_v2  ;;  %v3084_v8 = vpack.c.bf16 %v33_v5, %v32_v4  ;;  %v34_v10 = vld [vmem:[%s3692_s2 + $0x20] sm:$0xff]  ;;  %v35_v11 = vld [vmem:[%s3692_s2 + $0x28] sm:$0xff]  ;;  %v36_v13 = vld [vmem:[%s3692_s2 + $0x30] sm:$0xff]  ;;  %v3170_v30 = vmov 1983009808   ;;  %vm1095_vm4 = vcmask 64512  }
   0x4   :  { %v3088_v12 = vpack.c.bf16 %v35_v11, %v34_v10  ;;  %v37_v14 = vld [vmem:[%s3692_s2 + $0x38] sm:$0xff]  ;;  %v143_v31 = vunpack.c.l.s4 %v3170_v30  ;;  %v3171_v34 = vmov 1934713408   ;;  %s3174_s15 = smov 16   ;;  %s3175_s20 = smov 24   ;;  %vm2714_vm5 = vcmask 130048  }
   0x5   :  { %3081 = vmatprep.subr.bf16.mxu0 %v3080_v7  ;;  %v3092_v15 = vpack.c.bf16 %v37_v14, %v36_v13  ;;  %v175_v35 = vunpack.c.l.s4 %v3171_v34  ;;  %vm2717_vm6 = vcmask 195584   ;;  %vm2729_vm7 = vcmask 261120   ;;  %s3177_s27 = smov 40  }
   0x6   :  { %22 = vperm.xlu0 %3120, %v15_v6   ;;  %3083 = vmatpush3.bf16.msra.mxu0 %v3080_v7  ;;  %v144_v32 = vunpack.c.0.s8 %v143_v31  ;;  %vm2811_vm8 = vcmp.ge.s32.totalorder %v3230_v17, 2  ;;  %vm2852_vm9 = vcmask 326912   ;;  %vm2863_vm10 = vcmask 359744  }
   0x7   :  { %3085 = vmatprep.subr.bf16.mxu0 %v3084_v8  ;;  %v176_v40 = vunpack.c.0.s8 %v175_v35  ;;  %vm2866_vm11 = vcmask 523616  }
   0x8   :  { %v3277_v37 = vsub.s32 %v144_v32, %v3273_v33 }
   0x9   :  { %v3288_v45 = vsub.s32 %v176_v40, %v3273_v33 }
   0xa   :  { %3087 = vmatpush3.bf16.msra.mxu0 %v3084_v8 }
   0xb   :  { %3089 = vmatprep.subr.bf16.mxu0 %v3088_v12 }
   0xe   :  { %3091 = vmatpush3.bf16.msra.mxu0 %v3088_v12 }
   0xf   :  { %3093 = vmatprep.subr.bf16.mxu0 %v3092_v15 }
  0x12   :  { %3095 = vmatpush3.bf16.msra.mxu0 %v3092_v15 }
  0x13   :  { %3019 = vmatprep.subr.mxu0 %v3163_v9 }
  0x81   :  { %v20_v18 = vpop.permute.xlu0 %19 }
  0x82   :  { %vm24_vm1 = vcmp.eq.s32.totalorder %v20_v18, %v3230_v17 }
  0x83   :  { %v2873_v19 = vsel %vm24_vm1, 1.0, %v3163_v9 }
  0x84   :  { %2986 = vmatprep.mubr.msk.f32.mxu0 %vm38_vm0, %v2873_v19 }
  0x85   :  { %v23_v20 = vpop.permute.xlu0 %22 }
  0x86   :  { %vm25_vm2 = vcmp.eq.s32.totalorder %v23_v20, %v3230_v17 }
  0x87   :  { %v2874_v21 = vsel %vm25_vm2, 1.0, %v3163_v9 }
  0x88   :  { %2987 = vmatmul.mubr.msk.f32.vlgmr.msra.gmra.mrb[0].mxu0 %vm38_vm0, %v2874_v21 }
  0x89   :  { %3021 = vmatprep.mubr.msk.f32.mxu0 %vm3168_vm3, %v3163_v9 }
 0x15b   :  { %v3236_v22 = vpop.f32.mrb[0].mxu0 }
 0x15c   :  { %v111_v23 = vpop.f32.mrb[1].mxu0 }
 0x15d   :  { %134 = vrot.lane.b32.xlu0 %v111_v23, %s3164_s4  ;;  %122 = vrot.lane.b32.xlu1 %v111_v23, %s3165_s5 }
 0x161   :  { %130 = vrot.lane.b32.xlu0 %v3236_v22, %s3166_s6  ;;  %128 = vrot.lane.b32.xlu1 %v111_v23, %s3166_s6 }
 0x165   :  { %276 = vrot.lane.b32.xlu0 %v111_v23, %s3167_s7  ;;  %124 = vrot.lane.b32.xlu1 %v3236_v22, %s3165_s5 }
 0x169   :  { %136 = vrot.lane.b32.xlu1 %v3236_v22, %s3164_s4 }
 0x1cf   :  { %v3242_v24 = vpop.permute.xlu1 %122  ;;  %v3246_v25 = vpop.permute.xlu0 %134 }
 0x1d0   :  { %280 = vrot.lane.b32.xlu1 %v3242_v24, %s3167_s7  ;;  %v156_v38 = vcombine.low %v3242_v24, %v3246_v25  ;;  %v157_v41 = vcombine.high %v3242_v24, %v3246_v25 }
 0x1d2   :  { %v164_v43 = vrot.slane %v156_v38, %v3277_v37  ;;  %v171_v46 = vrot.slane %v157_v41, %v3277_v37 }
 0x1d3   :  { %v3248_v26 = vpop.permute.xlu1 %128  ;;  %v3262_v29 = vpop.permute.xlu0 %130 }
 0x1d4   :  { %288 = vrot.lane.b32.xlu1 %v3246_v25, %s3167_s7  ;;  %284 = vrot.lane.b32.xlu0 %v3248_v26, %s3167_s7  ;;  %v140_v36 = vcombine.low %v111_v23, %v3248_v26  ;;  %v141_v39 = vcombine.high %v111_v23, %v3248_v26  ;;  %v208_v54 = vcombine.low %v3236_v22, %v3262_v29 }
 0x1d5   :  { %v209_v58 = vcombine.high %v3236_v22, %v3262_v29 }
 0x1d6   :  { %v148_v42 = vrot.slane %v140_v36, %v3277_v37  ;;  %v155_v44 = vrot.slane %v141_v39, %v3277_v37  ;;  %v216_v63 = vrot.slane %v208_v54, %v3277_v37 }
 0x1d7   :  { %v3254_v27 = vpop.permute.xlu1 %124  ;;  %v277_v0 = vpop.permute.xlu0 %276  ;;  %v223_v4 = vrot.slane %v209_v58, %v3277_v37 }
 0x1d8   :  { %282 = vrot.lane.b32.xlu1 %v3254_v27, %s3167_s7  ;;  %278 = vrot.lane.b32.xlu0 %v3236_v22, %s3167_s7  ;;  %v172_v47 = vcombine.low %v148_v42, %v164_v43  ;;  %v173_v48 = vcombine.high %v148_v42, %v164_v43  ;;  %v188_v49 = vcombine.low %v155_v44, %v171_v46 }
 0x1d9   :  { %v189_v50 = vcombine.high %v155_v44, %v171_v46 }
 0x1da   :  { %v180_v52 = vrot.slane %v172_v47, %v3288_v45  ;;  %v187_v53 = vrot.slane %v173_v48, %v3288_v45  ;;  %v196_v56 = vrot.slane %v188_v49, %v3288_v45 }
 0x1db   :  { %v3260_v28 = vpop.permute.xlu1 %136  ;;  %v203_v57 = vrot.slane %v189_v50, %v3288_v45 }
 0x1dc   :  { %290 = vrot.lane.b32.xlu1 %v3260_v28, %s3167_s7  ;;  %286 = vrot.lane.b32.xlu0 %v3262_v29, %s3167_s7  ;;  %v224_v51 = vcombine.low %v3254_v27, %v3260_v28  ;;  %v225_v55 = vcombine.high %v3254_v27, %v3260_v28  ;;  %v596_v60 = vcombine.low %v180_v52, %v187_v53 }
 0x1dd   :  { %v2877_v61 = vcombine.high %v180_v52, %v187_v53  ;;  %v612_v2 = vcombine.low %v196_v56, %v203_v57  ;;  %v2878_v3 = vcombine.high %v196_v56, %v203_v57 }
 0x1de   :  { %v232_v59 = vrot.slane %v224_v51, %v3277_v37  ;;  %v239_v1 = vrot.slane %v225_v55, %v3277_v37  ;;  %v3308_v8 = vrot.slane %v596_v60, %v3277_v37 }
 0x1df   :  { %v3311_v10 = vrot.slane %v2877_v61, %v3277_v37  ;;  %v3314_v19 = vrot.slane %v612_v2, %v3277_v37  ;;  %v3317_v20 = vrot.slane %v2878_v3, %v3277_v37 }
 0x1e0   :  { %436 = vrot.lane.b32.xlu1 %v111_v23, %s3169_s8  ;;  %v240_v5 = vcombine.low %v216_v63, %v232_v59  ;;  %v241_v6 = vcombine.high %v216_v63, %v232_v59  ;;  %v256_v11 = vcombine.low %v223_v4, %v239_v1  ;;  %v257_v12 = vcombine.high %v223_v4, %v239_v1 }
 0x1e1   :  { %v628_v46 = vcombine.low %v3308_v8, %v3311_v10  ;;  %v644_v47 = vcombine.low %v3314_v19, %v3317_v20 }
 0x1e2   :  { %v248_v21 = vrot.slane %v240_v5, %v3288_v45  ;;  %v255_v23 = vrot.slane %v241_v6, %v3288_v45  ;;  %v264_v36 = vrot.slane %v256_v11, %v3288_v45  ;;  %v271_v38 = vrot.slane %v257_v12, %v3288_v45 }
 0x1e3   :  { %v636_v11 = vrot.slane %v628_v46, %v3288_v45  ;;  %v652_v12 = vrot.slane %v644_v47, %v3288_v45 }
 0x1e4   :  { %v664_v44 = vcombine.low %v248_v21, %v255_v23  ;;  %v2879_v53 = vcombine.high %v248_v21, %v255_v23  ;;  %v680_v54 = vcombine.low %v264_v36, %v271_v38 }
 0x242   :  { %v281_v62 = vpop.permute.xlu1 %280 }
 0x246   :  { %v289_v7 = vpop.permute.xlu1 %288  ;;  %v285_v13 = vpop.permute.xlu0 %284 }
 0x247   :  { %v316_v14 = vcombine.low %v281_v62, %v289_v7  ;;  %v317_v15 = vcombine.high %v281_v62, %v289_v7  ;;  %v300_v16 = vcombine.low %v277_v0, %v285_v13  ;;  %v301_v18 = vcombine.high %v277_v0, %v285_v13 }
 0x248   :  { %v3346_v13 = vrot.slane %v664_v44, %v3277_v37 }
 0x249   :  { %v324_v30 = vrot.slane %v316_v14, %v3277_v37  ;;  %v331_v31 = vrot.slane %v317_v15, %v3277_v37  ;;  %v308_v32 = vrot.slane %v300_v16, %v3277_v37  ;;  %v315_v34 = vrot.slane %v301_v18, %v3277_v37 }
 0x24a   :  { %v283_v35 = vpop.permute.xlu1 %282  ;;  %v279_v39 = vpop.permute.xlu0 %278  ;;  %v2880_v14 = vcombine.high %v264_v36, %v271_v38 }
 0x24b   :  { %v332_v40 = vcombine.low %v308_v32, %v324_v30  ;;  %v333_v41 = vcombine.high %v308_v32, %v324_v30  ;;  %v348_v42 = vcombine.low %v315_v34, %v331_v31  ;;  %v349_v43 = vcombine.high %v315_v34, %v331_v31 }
 0x24c   :  { %v3349_v31 = vrot.slane %v2879_v53, %v3277_v37  ;;  %v3352_v32 = vrot.slane %v680_v54, %v3277_v37 }
 0x24d   :  { %v340_v48 = vrot.slane %v332_v40, %v3288_v45  ;;  %v347_v49 = vrot.slane %v333_v41, %v3288_v45  ;;  %v356_v50 = vrot.slane %v348_v42, %v3288_v45  ;;  %v363_v51 = vrot.slane %v349_v43, %v3288_v45 }
 0x24e   :  { %v291_v52 = vpop.permute.xlu1 %290  ;;  %v287_v55 = vpop.permute.xlu0 %286  ;;  %v695_v41 = vrot.slane %v2880_v14, %v3277_v37  ;;  %v697_v53 = vcombine.high %v3346_v13, %v3349_v31 }
 0x24f   :  { %v384_v56 = vcombine.low %v283_v35, %v291_v52  ;;  %v385_v57 = vcombine.high %v283_v35, %v291_v52  ;;  %v732_v58 = vcombine.low %v340_v48, %v347_v49  ;;  %v2881_v59 = vcombine.high %v340_v48, %v347_v49 }
 0x250   :  { %v748_v60 = vcombine.low %v356_v50, %v363_v51  ;;  %v2882_v61 = vcombine.high %v356_v50, %v363_v51  ;;  %v368_v62 = vcombine.low %v279_v39, %v287_v55  ;;  %v369_v63 = vcombine.high %v279_v39, %v287_v55 }
 0x251   :  { %v392_v0 = vrot.slane %v384_v56, %v3277_v37  ;;  %v399_v1 = vrot.slane %v385_v57, %v3277_v37  ;;  %v739_v2 = vrot.slane %v732_v58, %v3277_v37  ;;  %v747_v3 = vrot.slane %v2881_v59, %v3277_v37 }
 0x252   :  { %v755_v4 = vrot.slane %v748_v60, %v3277_v37  ;;  %v763_v5 = vrot.slane %v2882_v61, %v3277_v37  ;;  %v376_v6 = vrot.slane %v368_v62, %v3277_v37  ;;  %v383_v7 = vrot.slane %v369_v63, %v3277_v37 }
 0x253   :  { %v764_v15 = vcombine.low %v739_v2, %v747_v3  ;;  %v765_v42 = vcombine.high %v739_v2, %v747_v3  ;;  %v629_v50 = vcombine.high %v3308_v8, %v3311_v10  ;;  %v645_v51 = vcombine.high %v3314_v19, %v3317_v20 }
 0x254   :  { %v780_v16 = vcombine.low %v755_v4, %v763_v5  ;;  %v400_v18 = vcombine.low %v376_v6, %v392_v0  ;;  %v401_v21 = vcombine.high %v376_v6, %v392_v0  ;;  %v416_v23 = vcombine.low %v383_v7, %v399_v1 }
 0x255   :  { %v417_v30 = vcombine.high %v383_v7, %v399_v1  ;;  %v772_v34 = vrot.slane %v764_v15, %v3288_v45  ;;  %v781_v43 = vcombine.high %v755_v4, %v763_v5  ;;  %v660_v52 = vcombine.low %v636_v11, %v652_v12 }
 0x256   :  { %v788_v35 = vrot.slane %v780_v16, %v3288_v45  ;;  %v408_v39 = vrot.slane %v400_v18, %v3288_v45  ;;  %v415_v36 = vrot.slane %v401_v21, %v3288_v45  ;;  %v424_v38 = vrot.slane %v416_v23, %v3288_v45 }
 0x257   :  { %v431_v40 = vrot.slane %v417_v30, %v3288_v45  ;;  %v779_v8 = vrot.slane %v765_v42, %v3288_v45  ;;  %v795_v10 = vrot.slane %v781_v43, %v3288_v45  ;;  %v713_v19 = vcombine.high %v3352_v32, %v695_v41  ;;  %v1004_v42 = vld [vmem:[%s3693_s1] sm:$0xff]  ;;  %s3173_s1 = smov 8  }
 0x258   :  { %v796_v44 = vcombine.low %v772_v34, %v788_v35  ;;  %v800_v46 = vcombine.low %v408_v39, %v415_v36  ;;  %v2883_v47 = vcombine.high %v408_v39, %v415_v36  ;;  %v797_v58 = vcombine.high %v772_v34, %v788_v35 }
 0x259   :  { %v816_v48 = vcombine.low %v424_v38, %v431_v40  ;;  %v2884_v49 = vcombine.high %v424_v38, %v431_v40  ;;  %v643_v60 = vrot.slane %v629_v50, %v3288_v45  ;;  %v659_v61 = vrot.slane %v645_v51, %v3288_v45 }
 0x25a   :  { %2990 = vmatpush3.xpose.msk.msra.mxu1 %vm1095_vm4, %v796_v44  ;;  %v807_v54 = vrot.slane %v800_v46, %v3277_v37  ;;  %v815_v55 = vrot.slane %v2883_v47, %v3277_v37  ;;  %v661_v62 = vcombine.high %v636_v11, %v652_v12  ;;  %v711_v1 = vrot.slane %v697_v53, %v3288_v45 }
 0x25b   :  { %v823_v56 = vrot.slane %v816_v48, %v3277_v37  ;;  %v831_v57 = vrot.slane %v2884_v49, %v3277_v37  ;;  %2994 = vmatprep.subr.mxu1 %v3163_v9  ;;  %v798_v4 = vcombine.low %v779_v8, %v795_v10  ;;  %v727_v5 = vrot.slane %v713_v19, %v3288_v45 }
 0x25c   :  { %v833_v20 = vcombine.high %v807_v54, %v815_v55  ;;  %v832_v2 = vcombine.low %v807_v54, %v815_v55  ;;  %v662_v7 = vcombine.low %v643_v60, %v659_v61  ;;  %v696_v11 = vcombine.low %v3346_v13, %v3349_v31 }
 0x25d   :  { %v849_v59 = vcombine.high %v823_v56, %v831_v57  ;;  %2992 = vmatmul.mubr.msk.f32.vlgmr.msra.gmra.mrb[0].mxu1 %vm1095_vm4, %v660_v52  ;;  %v848_v3 = vcombine.low %v823_v56, %v831_v57  ;;  %v712_v12 = vcombine.low %v3352_v32, %v695_v41  ;;  %v730_v14 = vcombine.low %v711_v1, %v727_v5 }
 0x25e   :  { %2995 = vmatpush3.xpose.msk.msra.mxu1 %vm1095_vm4, %v797_v58  ;;  %2996 = vmatprep.mubr.msk.f32.mxu1 %vm3168_vm3, %v3163_v9  ;;  %v847_v63 = vrot.slane %v833_v20, %v3288_v45  ;;  %v799_v15 = vcombine.high %v779_v8, %v795_v10  ;;  %v840_v16 = vrot.slane %v832_v2, %v3288_v45  ;;  %v3172_v36 = vmov 1966171168  }
 0x25f   :  { %2999 = vmatprep.subr.mxu1 %v3163_v9  ;;  %v863_v0 = vrot.slane %v849_v59, %v3288_v45  ;;  %v856_v18 = vrot.slane %v848_v3, %v3288_v45  ;;  %v663_v13 = vcombine.high %v643_v60, %v659_v61  ;;  %v704_v21 = vrot.slane %v696_v11, %v3288_v45 }
 0x260   :  { %v720_v23 = vrot.slane %v712_v12, %v3288_v45  ;;  %v731_v39 = vcombine.high %v711_v1, %v727_v5  ;;  %v1008_v38 = vunpack.c.l.s4 %v3172_v36  ;;  %v1006_v44 = vcombine.high %v1004_v42, %v1004_v42 }
 0x261   :  { %2997 = vmatmul.mubr.msk.f32.vlgmr.msra.gmra.mrb[2].mxu1 %vm1095_vm4, %v661_v62  ;;  %v866_v6 = vcombine.low %v847_v63, %v863_v0  ;;  %v864_v30 = vcombine.low %v840_v16, %v856_v18  ;;  %v865_v32 = vcombine.high %v840_v16, %v856_v18  ;;  %v867_v35 = vcombine.high %v847_v63, %v863_v0 }
 0x262   :  { %3000 = vmatpush3.xpose.msk.msra.mxu1 %vm1095_vm4, %v798_v4  ;;  %3001 = vmatprep.mubr.msk.f32.mxu1 %vm3168_vm3, %v3163_v9  ;;  %v728_v31 = vcombine.low %v704_v21, %v720_v23  ;;  %v729_v34 = vcombine.high %v704_v21, %v720_v23  ;;  %v1009_v40 = vunpack.c.0.s8 %v1008_v38  ;;  %v1057_v46 = vsub.s32 0, %v3273_v33 }
 0x263   :  { %3020 = vmatpush3.xpose.msk.msra.mxu0 %vm1095_vm4, %v866_v6  ;;  %3004 = vmatprep.subr.mxu1 %v3163_v9 }
 0x264   :  { %3029 = vmatprep.subr.mxu0 %v3163_v9  ;;  %v1012_v41 = vsub.s32 %v1009_v40, %v3273_v33 }
 0x265   :  { %3002 = vmatmul.mubr.msk.f32.vlgmr.msra.gmra.mrb[4].mxu1 %vm1095_vm4, %v662_v7 }
 0x266   :  { %3022 = vmatmul.mubr.msk.f32.vlgmr.msra.gmra.mrb[2].mxu0 %vm1095_vm4, %v730_v14  ;;  %3005 = vmatpush3.xpose.msk.msra.mxu1 %vm1095_vm4, %v799_v15  ;;  %v1013_v43 = vrot.slane %v1004_v42, %v1012_v41  ;;  %v1020_v49 = vrot.slane %v1006_v44, %v1012_v41 }
 0x267   :  { %3006 = vmatprep.mubr.msk.f32.mxu1 %vm3168_vm3, %v3163_v9  ;;  %3009 = vmatprep.subr.mxu1 %v3163_v9 }
 0x268   :  { %3031 = vmatprep.mubr.msk.f32.mxu0 %vm3168_vm3, %v3163_v9  ;;  %v1029_v47 = vrot.slane %v1013_v43, %v1012_v41  ;;  %v1021_v48 = vcombine.high %v1013_v43, %v1013_v43  ;;  %v1036_v52 = vrot.slane %v1020_v49, %v1012_v41  ;;  %v1022_v2 = vcombine.high %v1020_v49, %v1020_v49 }
 0x269   :  { %3007 = vmatmul.mubr.msk.f32.vlgmr.msra.gmra.mrb[6].mxu1 %vm1095_vm4, %v663_v13 }
 0x26a   :  { %3010 = vmatpush3.xpose.msk.msra.mxu1 %vm1095_vm4, %v864_v30  ;;  %3011 = vmatprep.mubr.msk.f32.mxu1 %vm3168_vm3, %v3163_v9  ;;  %v1058_v50 = vrot.slane %v1029_v47, %v1057_v46  ;;  %v1043_v51 = vrot.slane %v1021_v48, %v1012_v41  ;;  %v1051_v57 = vcombine.high %v1029_v47, %v1029_v47 }
 0x26b   :  { %3014 = vmatprep.subr.mxu1 %v3163_v9  ;;  %v1052_v58 = vcombine.high %v1036_v52, %v1036_v52  ;;  %v1074_v14 = vrot.slane %v1036_v52, %v1057_v46  ;;  %v1050_v15 = vrot.slane %v1022_v2, %v1012_v41 }
 0x26c   :  { %v1062_v56 = vrot.slane %v1043_v51, %v1057_v46  ;;  %v1066_v20 = vrot.slane %v1051_v57, %v1057_v46  ;;  %v1053_v59 = vcombine.high %v1043_v51, %v1043_v51 }
 0x26d   :  { %3012 = vmatmul.mubr.msk.f32.vlgmr.msra.gmra.mrb[8].mxu1 %vm1095_vm4, %v728_v31  ;;  %v1082_v60 = vrot.slane %v1052_v58, %v1057_v46  ;;  %v1078_v30 = vrot.slane %v1050_v15, %v1057_v46  ;;  %v1054_v31 = vcombine.high %v1050_v15, %v1050_v15 }
 0x26e   :  { %3015 = vmatpush3.xpose.msk.msra.mxu1 %vm1095_vm4, %v865_v32  ;;  %3016 = vmatprep.mubr.msk.f32.mxu1 %vm3168_vm3, %v3163_v9  ;;  %v1070_v1 = vrot.slane %v1053_v59, %v1057_v46 }
 0x26f   :  { %3024 = vmatprep.subr.mxu1 %v3163_v9  ;;  %v1086_v36 = vrot.slane %v1054_v31, %v1057_v46  ;;  %v437_v46 = vpop.permute.xlu1 %436 }
 0x271   :  { %3017 = vmatmul.mubr.msk.f32.vlgmr.msra.gmra.mrb[10].mxu1 %vm1095_vm4, %v729_v34 }
 0x272   :  { %3025 = vmatpush3.xpose.msk.msra.mxu1 %vm1095_vm4, %v867_v35  ;;  %3026 = vmatprep.mubr.msk.f32.mxu1 %vm3168_vm3, %v3163_v9 }
 0x273   :  { %3034 = vmatprep.subr.mxu1 %v3163_v9 }
 0x275   :  { %3027 = vmatmul.mubr.msk.f32.vlgmr.msra.gmra.mrb[12].mxu1 %vm1095_vm4, %v731_v39 }
 0x276   :  { %3036 = vmatprep.mubr.msk.f32.mxu1 %vm3168_vm3, %v3163_v9 }
 0x330   :  { %v1168_v53 = vpop.f32.mrb[0].mxu1 }
 0x331   :  { %v3432_v54 = vadd.f32 %v1168_v53, %v1058_v50  ;;  %v2993_v55 = vpop.f32.mrb[1].mxu1 }
 0x333   :  { %v1704_v8 = vsel %vm1095_vm4, %v3432_v54, -inf }
 0x334   :  { %1705 = vmax.xlane.f32.xlu0 %v1704_v8  ;;  %v1244_v10 = vpop.f32.mrb[2].mxu1 }
 0x335   :  { %v3436_v19 = vadd.f32 %v1244_v10, %v1062_v56  ;;  %v2998_v33 = vpop.f32.mrb[3].mxu1 }
 0x337   :  { %v1707_v18 = vsel %vm1095_vm4, %v3436_v19, -inf }
 0x338   :  { %v1320_v61 = vpop.f32.mrb[4].mxu1 }
 0x339   :  { %v1321_v62 = vadd.f32 %v1320_v61, %v1066_v20  ;;  %v1624_v63 = vpop.f32.mrb[2].mxu0  ;;  %v3003_v0 = vpop.f32.mrb[5].mxu1 }
 0x33a   :  { %v1625_v3 = vadd.f32 %v1624_v63, %v1082_v60  ;;  %v3023_v4 = vpop.f32.mrb[3].mxu0 }
 0x33b   :  { %v1710_v5 = vsel %vm1095_vm4, %v1321_v62, -inf }
 0x33c   :  { %1711 = vmax.xlane.f32.xlu0 %v1710_v5  ;;  %v1396_v6 = vpop.f32.mrb[6].mxu1  ;;  %v1722_v7 = vsel %vm1095_vm4, %v1625_v3, -inf }
 0x33d   :  { %v1397_v11 = vadd.f32 %v1396_v6, %v1070_v1  ;;  %1723 = vmax.xlane.f32.xlu1 %v1722_v7  ;;  %v3008_v12 = vpop.f32.mrb[7].mxu1 }
 0x33f   :  { %v1713_v16 = vsel %vm1095_vm4, %v1397_v11, -inf }
 0x340   :  { %1714 = vmax.xlane.f32.xlu0 %v1713_v16  ;;  %v1472_v13 = vpop.f32.mrb[8].mxu1 }
 0x341   :  { %1708 = vmax.xlane.f32.xlu1 %v1707_v18  ;;  %v1473_v21 = vadd.f32 %v1472_v13, %v1074_v14  ;;  %v3013_v23 = vpop.f32.mrb[9].mxu1 }
 0x343   :  { %v1716_v32 = vsel %vm1095_vm4, %v1473_v21, -inf }
 0x344   :  { %v1548_v34 = vpop.f32.mrb[10].mxu1 }
 0x345   :  { %1717 = vmax.xlane.f32.xlu1 %v1716_v32  ;;  %v1549_v35 = vadd.f32 %v1548_v34, %v1078_v30  ;;  %v3018_v39 = vpop.f32.mrb[11].mxu1 }
 0x347   :  { %v1719_v38 = vsel %vm1095_vm4, %v1549_v35, -inf }
 0x348   :  { %1720 = vmax.xlane.f32.xlu0 %v1719_v38  ;;  %v1700_v40 = vpop.f32.mrb[12].mxu1 }
 0x349   :  { %v1701_v41 = vadd.f32 %v1700_v40, %v1086_v36  ;;  %v3028_v42 = vpop.f32.mrb[13].mxu1 }
 0x34b   :  { %v1725_v43 = vsel %vm1095_vm4, %v1701_v41, -inf }
 0x34c   :  { %1726 = vmax.xlane.f32.xlu0 %v1725_v43 }
 0x356   :  { %444 = vrot.lane.b32.xlu1 %v3248_v26, %s3169_s8 }
 0x35a   :  { %448 = vrot.lane.b32.xlu1 %v3246_v25, %s3169_s8 }
 0x35e   :  { %442 = vrot.lane.b32.xlu1 %v3254_v27, %s3169_s8 }
 0x362   :  { %440 = vrot.lane.b32.xlu0 %v3242_v24, %s3169_s8 }
 0x366   :  { %438 = vrot.lane.b32.xlu0 %v3236_v22, %s3169_s8 }
 0x3c1   :  { %v1706_v44 = vpop.xlane.xlu0 %1705 }
 0x3c2   :  { %v1728_v47 = vsub.f32 %v3432_v54, %v1706_v44 }
 0x3c4   :  { %v1736_v51 = vmul.f32 1.442695, %v1728_v47 }
 0x3c9   :  { %v1712_v48 = vpop.xlane.xlu0 %1711 }
 0x3ca   :  { %v1730_v49 = vsub.f32 %v1321_v62, %v1712_v48  ;;  %v1724_v50 = vpop.xlane.xlu1 %1723 }
 0x3cb   :  { %v1734_v26 = vsub.f32 %v1625_v3, %v1724_v50 }
 0x3cc   :  { %v1740_v53 = vmul.f32 1.442695, %v1730_v49 }
 0x3cd   :  { %v1748_v52 = vmul.f32 1.442695, %v1734_v26  ;;  %v1715_v25 = vpop.xlane.xlu0 %1714 }
 0x3ce   :  { %v1731_v55 = vsub.f32 %v1397_v11, %v1715_v25  ;;  %v1709_v27 = vpop.xlane.xlu1 %1708 }
 0x3cf   :  { %3122 = vpow2.f32 %v1748_v52  ;;  %v1729_v24 = vsub.f32 %v3436_v19, %v1709_v27 }
 0x3d0   :  { %3124 = vpow2.f32 %v1736_v51  ;;  %v1742_v56 = vmul.f32 1.442695, %v1731_v55 }
 0x3d1   :  { %v1738_v22 = vmul.f32 1.442695, %v1729_v24  ;;  %3126 = vpow2.f32 %v1740_v53 }
 0x3d2   :  { %v1718_v57 = vpop.xlane.xlu1 %1717 }
 0x3d3   :  { %3128 = vpow2.f32 %v1738_v22  ;;  %v1732_v54 = vsub.f32 %v1473_v21, %v1718_v57 }
 0x3d4   :  { %3130 = vpow2.f32 %v1742_v56 }
 0x3d5   :  { %v1744_v58 = vmul.f32 1.442695, %v1732_v54  ;;  %v1721_v8 = vpop.xlane.xlu0 %1720 }
 0x3d6   :  { %v1733_v10 = vsub.f32 %v1549_v35, %v1721_v8  ;;  %v445_v33 = vpop.permute.xlu1 %444 }
 0x3d7   :  { %3132 = vpow2.f32 %v1744_v58  ;;  %v460_v0 = vcombine.low %v437_v46, %v445_v33  ;;  %v461_v1 = vcombine.high %v437_v46, %v445_v33 }
 0x3d8   :  { %v1746_v20 = vmul.f32 1.442695, %v1733_v10 }
 0x3d9   :  { %v3458_v59 = vpop.eup %3122  ;;  %v1727_v60 = vpop.xlane.xlu0 %1726  ;;  %v468_v15 = vrot.slane %v460_v0, %v3277_v37  ;;  %v475_v16 = vrot.slane %v461_v1, %v3277_v37 }
 0x3da   :  { %v3460_v61 = vpop.eup %3124  ;;  %3134 = vpow2.f32 %v1746_v20  ;;  %v1735_v19 = vsub.f32 %v1701_v41, %v1727_v60  ;;  %v1770_v62 = vsel %vm1095_vm4, %v3458_v59, 0.0  ;;  %v449_v4 = vpop.permute.xlu1 %448 }
 0x3db   :  { %1771 = vadd.xlane.f32.xlu1 %v1770_v62  ;;  %v3464_v63 = vpop.eup %3126  ;;  %v1752_v6 = vsel %vm1095_vm4, %v3460_v61, 0.0 }
 0x3dc   :  { %v1750_v2 = vmul.f32 1.442695, %v1735_v19  ;;  %v1758_v21 = vsel %vm1095_vm4, %v3464_v63, 0.0 }
 0x3dd   :  { %v3466_v3 = vpop.eup %3128  ;;  %v441_v5 = vpop.permute.xlu0 %440 }
 0x3de   :  { %v3470_v7 = vpop.eup %3130  ;;  %3136 = vpow2.f32 %v1750_v2  ;;  %v476_v11 = vcombine.low %v441_v5, %v449_v4  ;;  %v477_v12 = vcombine.high %v441_v5, %v449_v4  ;;  %v1755_v14 = vsel %vm1095_vm4, %v3466_v3, 0.0  ;;  %v443_v20 = vpop.permute.xlu1 %442 }
 0x3df   :  { %1753 = vadd.xlane.f32.xlu1 %v1752_v6  ;;  %1756 = vadd.xlane.f32.xlu0 %v1755_v14  ;;  %v1761_v23 = vsel %vm1095_vm4, %v3470_v7, 0.0 }
 0x3e0   :  { %v484_v18 = vrot.slane %v476_v11, %v3277_v37  ;;  %v491_v13 = vrot.slane %v477_v12, %v3277_v37 }
 0x3e1   :  { %v3482_v30 = vpop.eup %3132  ;;  %v439_v60 = vpop.permute.xlu0 %438 }
 0x3e2   :  { %v492_v31 = vcombine.low %v468_v15, %v484_v18  ;;  %v493_v32 = vcombine.high %v468_v15, %v484_v18  ;;  %v508_v34 = vcombine.low %v475_v16, %v491_v13  ;;  %v509_v35 = vcombine.high %v475_v16, %v491_v13 }
 0x3e3   :  { %1759 = vadd.xlane.f32.xlu1 %v1758_v21  ;;  %1762 = vadd.xlane.f32.xlu0 %v1761_v23  ;;  %v1764_v43 = vsel %vm1095_vm4, %v3482_v30, 0.0 }
 0x3e4   :  { %v3484_v39 = vpop.eup %3134  ;;  %v500_v36 = vrot.slane %v492_v31, %v3288_v45  ;;  %v507_v38 = vrot.slane %v493_v32, %v3288_v45  ;;  %v516_v40 = vrot.slane %v508_v34, %v3288_v45  ;;  %v523_v41 = vrot.slane %v509_v35, %v3288_v45 }
 0x3e5   :  { %v1767_v42 = vsel %vm1095_vm4, %v3484_v39, 0.0 }
 0x3e6   :  { %v868_v44 = vcombine.low %v500_v36, %v507_v38  ;;  %v2885_v46 = vcombine.high %v500_v36, %v507_v38  ;;  %v884_v47 = vcombine.low %v516_v40, %v523_v41  ;;  %v2886_v48 = vcombine.high %v516_v40, %v523_v41 }
 0x3e7   :  { %1768 = vadd.xlane.f32.xlu0 %v1767_v42  ;;  %1765 = vadd.xlane.f32.xlu1 %v1764_v43 }
 0x3e8   :  { %v3494_v49 = vpop.eup %3136  ;;  %v875_v50 = vrot.slane %v868_v44, %v3277_v37  ;;  %v883_v26 = vrot.slane %v2885_v46, %v3277_v37  ;;  %v891_v51 = vrot.slane %v884_v47, %v3277_v37  ;;  %v899_v52 = vrot.slane %v2886_v48, %v3277_v37 }
 0x3e9   :  { %v1773_v25 = vsel %vm1095_vm4, %v3494_v49, 0.0 }
 0x3ea   :  { %v900_v53 = vcombine.low %v875_v50, %v883_v26  ;;  %v916_v55 = vcombine.low %v891_v51, %v899_v52  ;;  %v901_v27 = vcombine.high %v875_v50, %v883_v26  ;;  %v917_v24 = vcombine.high %v891_v51, %v899_v52 }
 0x3eb   :  { %1774 = vadd.xlane.f32.xlu0 %v1773_v25 }
 0x3ec   :  { %v908_v56 = vrot.slane %v900_v53, %v3288_v45  ;;  %v924_v22 = vrot.slane %v916_v55, %v3288_v45  ;;  %v3505_v57 = vrot.slane %v901_v27, %v3288_v45  ;;  %v3508_v54 = vrot.slane %v917_v24, %v3288_v45 }
 0x3ee   :  { %v932_v58 = vcombine.low %v908_v56, %v924_v22  ;;  %v933_v8 = vcombine.high %v908_v56, %v924_v22  ;;  %v934_v10 = vcombine.low %v3505_v57, %v3508_v54  ;;  %v935_v33 = vcombine.high %v3505_v57, %v3508_v54 }
 0x3f0   :  { %3030 = vmatpush3.msra.mxu0 %v932_v58  ;;  %3035 = vmatpush3.msra.mxu1 %v933_v8 }
 0x3f1   :  { %3039 = vmatprep.subr.mxu0 %v3163_v9  ;;  %3044 = vmatprep.subr.mxu1 %v3163_v9 }
 0x3f8   :  { %450 = vrot.lane.b32.xlu1 %v3260_v28, %s3169_s8 }
 0x401   :  { %446 = vrot.lane.b32.xlu0 %v3262_v29, %s3169_s8 }
 0x468   :  { %v1772_v19 = vpop.xlane.xlu1 %1771 }
 0x469   :  { %3138 = vrcp.f32 %v1772_v19 }
 0x46c   :  { %v1757_v62 = vpop.xlane.xlu0 %1756  ;;  %v1754_v0 = vpop.xlane.xlu1 %1753 }
 0x46d   :  { %3140 = vrcp.f32 %v1757_v62 }
 0x46e   :  { %3142 = vrcp.f32 %v1754_v0 }
 0x470   :  { %v1763_v1 = vpop.xlane.xlu0 %1762  ;;  %v1760_v2 = vpop.xlane.xlu1 %1759 }
 0x471   :  { %3144 = vrcp.f32 %v1763_v1 }
 0x472   :  { %3146 = vrcp.f32 %v1760_v2 }
 0x473   :  { %v3139_v4 = vpop.eup %3138 }
 0x474   :  { %v1790_v5 = vmul.f32 %v3139_v4, %v1772_v19  ;;  %v1769_v6 = vpop.xlane.xlu0 %1768  ;;  %v1766_v11 = vpop.xlane.xlu1 %1765 }
 0x475   :  { %3148 = vrcp.f32 %v1769_v6 }
 0x476   :  { %v1798_v28 = vsub.f32 2.0, %v1790_v5  ;;  %3150 = vrcp.f32 %v1766_v11 }
 0x477   :  { %v3141_v29 = vpop.eup %3140 }
 0x478   :  { %v3143_v12 = vpop.eup %3142  ;;  %v1785_v14 = vmul.f32 %v3141_v29, %v1757_v62  ;;  %v1775_v15 = vpop.xlane.xlu0 %1774  ;;  %v1806_v13 = vmul.f32 %v3139_v4, %v1798_v28 }
 0x479   :  { %v451_v16 = vpop.permute.xlu1 %450  ;;  %v1784_v18 = vmul.f32 %v3143_v12, %v1754_v0  ;;  %3152 = vrcp.f32 %v1775_v15 }
 0x47a   :  { %v1793_v21 = vsub.f32 2.0, %v1785_v14  ;;  %v544_v23 = vcombine.low %v443_v20, %v451_v16  ;;  %v545_v38 = vcombine.high %v443_v20, %v451_v16  ;;  %v3521_v46 = vmul.f32 %v3458_v59, %v1806_v13 }
 0x47b   :  { %v3145_v31 = vpop.eup %3144  ;;  %v1792_v32 = vsub.f32 2.0, %v1784_v18 }
 0x47c   :  { %v3147_v34 = vpop.eup %3146  ;;  %v1801_v35 = vmul.f32 %v3141_v29, %v1793_v21  ;;  %v1787_v36 = vmul.f32 %v3145_v31, %v1763_v1  ;;  %v447_v40 = vpop.permute.xlu0 %446  ;;  %v552_v50 = vrot.slane %v544_v23, %v3277_v37  ;;  %v559_v59 = vrot.slane %v545_v38, %v3277_v37 }
 0x47d   :  { %v1800_v41 = vmul.f32 %v3143_v12, %v1792_v32  ;;  %v1786_v42 = vmul.f32 %v3147_v34, %v1760_v2  ;;  %v528_v43 = vcombine.low %v439_v60, %v447_v40  ;;  %v529_v44 = vcombine.high %v439_v60, %v447_v40 }
 0x47e   :  { %v1809_v47 = vmul.f32 %v3466_v3, %v1801_v35  ;;  %v1795_v48 = vsub.f32 2.0, %v1787_v36 }
 0x47f   :  { %v3149_v26 = vpop.eup %3148  ;;  %v1808_v51 = vmul.f32 %v3460_v61, %v1800_v41  ;;  %v1794_v52 = vsub.f32 2.0, %v1786_v42  ;;  %v536_v25 = vrot.slane %v528_v43, %v3277_v37  ;;  %v543_v53 = vrot.slane %v529_v44, %v3277_v37 }
 0x480   :  { %v3151_v55 = vpop.eup %3150  ;;  %v1817_v27 = vsel %vm1095_vm4, %v1809_v47, 0.0  ;;  %v1803_v24 = vmul.f32 %v3145_v31, %v1795_v48  ;;  %v1789_v56 = vmul.f32 %v3149_v26, %v1769_v6  ;;  %3037 = vmatmul.mubr.msk.f32.vlgmr.msra.gmra.mrb[14].mxu1 %vm1095_vm4, %v1809_v47  ;;  %v1826_v43 = vsel %vm1095_vm4, %v3521_v46, 0.0 }
 0x481   :  { %v1816_v3 = vsel %vm1095_vm4, %v1808_v51, 0.0  ;;  %v1802_v22 = vmul.f32 %v3147_v34, %v1794_v52  ;;  %v1788_v58 = vmul.f32 %v3151_v55, %v1766_v11  ;;  %v560_v8 = vcombine.low %v536_v25, %v552_v50  ;;  %3032 = vmatmul.mubr.msk.f32.vlgmr.msra.gmra.mrb[4].mxu0 %vm1095_vm4, %v1808_v51  ;;  %3045 = vmatpush3.msra.mxu1 %v935_v33 }
 0x482   :  { %v1811_v61 = vmul.f32 %v3470_v7, %v1803_v24  ;;  %v1797_v20 = vsub.f32 2.0, %v1789_v56  ;;  %v561_v60 = vcombine.high %v536_v25, %v552_v50  ;;  %v576_v19 = vcombine.low %v543_v53, %v559_v59  ;;  %3040 = vmatpush3.msra.mxu0 %v934_v10  ;;  %3041 = vmatprep.mubr.msk.f32.mxu0 %vm3168_vm3, %v3163_v9 }
 0x483   :  { %v3153_v62 = vpop.eup %3152  ;;  %v1810_v0 = vmul.f32 %v3464_v63, %v1802_v22  ;;  %v1796_v1 = vsub.f32 2.0, %v1788_v58  ;;  %v568_v2 = vrot.slane %v560_v8, %v3288_v45  ;;  %v577_v4 = vcombine.high %v543_v53, %v559_v59  ;;  %3046 = vmatprep.mubr.msk.f32.mxu1 %vm3168_vm3, %v3163_v9  ;;  %3049 = vmatprep.subr.mxu0 %v3163_v9 }
 0x484   :  { %v1805_v7 = vmul.f32 %v3149_v26, %v1797_v20  ;;  %v1791_v33 = vmul.f32 %v3153_v62, %v1775_v15  ;;  %v575_v57 = vrot.slane %v561_v60, %v3288_v45  ;;  %v584_v54 = vrot.slane %v576_v19, %v3288_v45  ;;  %3047 = vmatmul.mubr.msk.f32.vlgmr.msra.gmra.mrb[16].mxu1 %vm1095_vm4, %v1811_v61 }
 0x485   :  { %v1804_v10 = vmul.f32 %v3151_v55, %v1796_v1  ;;  %v591_v63 = vrot.slane %v577_v4, %v3288_v45  ;;  %3042 = vmatmul.mubr.msk.f32.vlgmr.msra.gmra.mrb[6].mxu0 %vm1095_vm4, %v1810_v0  ;;  %3054 = vmatprep.subr.mxu1 %v3163_v9  ;;  %v1818_v5 = vadd.f32 %v1817_v27, %v1816_v3  ;;  %v1819_v6 = vsel %vm1095_vm4, %v1810_v0, 0.0 }
 0x486   :  { %v1813_v11 = vmul.f32 %v3484_v39, %v1805_v7  ;;  %v1799_v28 = vsub.f32 2.0, %v1791_v33  ;;  %v936_v29 = vcombine.low %v568_v2, %v575_v57  ;;  %v2887_v12 = vcombine.high %v568_v2, %v575_v57  ;;  %3051 = vmatprep.mubr.msk.f32.mxu0 %vm3168_vm3, %v3163_v9  ;;  %3056 = vmatprep.mubr.msk.f32.mxu1 %vm3168_vm3, %v3163_v9 }
 0x487   :  { %v1812_v14 = vmul.f32 %v3482_v30, %v1804_v10  ;;  %v952_v15 = vcombine.low %v584_v54, %v591_v63  ;;  %v2888_v16 = vcombine.high %v584_v54, %v591_v63  ;;  %v1820_v18 = vadd.f32 %v1819_v6, %v1818_v5 }
 0x488   :  { %v1824_v13 = vsel %vm1095_vm4, %v1813_v11, 0.0  ;;  %v1807_v21 = vmul.f32 %v3153_v62, %v1799_v28  ;;  %v943_v23 = vrot.slane %v936_v29, %v3277_v37  ;;  %v951_v39 = vrot.slane %v2887_v12, %v3277_v37 }
 0x489   :  { %v1823_v31 = vsel %vm1095_vm4, %v1812_v14, 0.0  ;;  %v959_v32 = vrot.slane %v952_v15, %v3277_v37  ;;  %v967_v34 = vrot.slane %v2888_v16, %v3277_v37  ;;  %v1821_v35 = vsel %vm1095_vm4, %v1811_v61, 0.0 }
 0x48a   :  { %v1815_v30 = vmul.f32 %v3494_v49, %v1807_v21  ;;  %v968_v36 = vcombine.low %v943_v23, %v951_v39  ;;  %v969_v38 = vcombine.high %v943_v23, %v951_v39  ;;  %v1825_v40 = vadd.f32 %v1824_v13, %v1823_v31 }
 0x48b   :  { %v984_v41 = vcombine.low %v959_v32, %v967_v34  ;;  %v985_v42 = vcombine.high %v959_v32, %v967_v34  ;;  %v3570_v44 = vadd.f32 %v1821_v35, %v1820_v18 }
 0x48c   :  { %v976_v47 = vrot.slane %v968_v36, %v3288_v45  ;;  %v1827_v48 = vadd.f32 %v1826_v43, %v1825_v40  ;;  %v1828_v50 = vsel %vm1095_vm4, %v1815_v30, 0.0  ;;  %v983_v51 = vrot.slane %v969_v38, %v3288_v45 }
 0x48d   :  { %v992_v26 = vrot.slane %v984_v41, %v3288_v45  ;;  %v999_v49 = vrot.slane %v985_v42, %v3288_v45 }
 0x48e   :  { %v3577_v52 = vadd.f32 %v1828_v50, %v1827_v48 }
 0x48f   :  { %v1000_v25 = vcombine.low %v976_v47, %v992_v26  ;;  %v1001_v53 = vcombine.high %v976_v47, %v992_v26  ;;  %v1002_v55 = vcombine.low %v983_v51, %v999_v49  ;;  %v1003_v27 = vcombine.high %v983_v51, %v999_v49 }
 0x491   :  { %3050 = vmatpush3.msra.mxu0 %v1000_v25  ;;  %3055 = vmatpush3.msra.mxu1 %v1001_v53 }
 0x492   :  { %3052 = vmatmul.mubr.msk.f32.vlgmr.msra.gmra.mrb[8].mxu0 %vm1095_vm4, %v1812_v14  ;;  %3057 = vmatmul.mubr.msk.f32.vlgmr.msra.gmra.mrb[18].mxu1 %vm1095_vm4, %v1813_v11 }
 0x493   :  { %3059 = vmatprep.subr.mxu0 %v3163_v9  ;;  %3064 = vmatprep.subr.mxu1 %v3163_v9 }
 0x494   :  { %3060 = vmatpush3.msra.mxu0 %v1002_v55  ;;  %3065 = vmatpush3.msra.mxu1 %v1003_v27 }
 0x495   :  { %3061 = vmatprep.mubr.msk.f32.mxu0 %vm3168_vm3, %v3163_v9  ;;  %3066 = vmatprep.mubr.msk.f32.mxu1 %vm3168_vm3, %v3163_v9 }
 0x496   :  { %3062 = vmatmul.mubr.msk.f32.vlgmr.msra.gmra.mrb[10].mxu0 %vm1095_vm4, %v3521_v46  ;;  %3067 = vmatmul.mubr.msk.f32.vlgmr.msra.gmra.mrb[20].mxu1 %vm1095_vm4, %v1815_v30 }
 0x553   :  { %v1974_v24 = vpop.f32.mrb[14].mxu1 }
 0x554   :  { %v1901_v56 = vpop.f32.mrb[4].mxu0  ;;  %v3038_v59 = vpop.f32.mrb[15].mxu1 }
 0x555   :  { %v3033_v3 = vpop.f32.mrb[5].mxu0 }
 0x557   :  { %v2120_v22 = vpop.f32.mrb[16].mxu1 }
 0x558   :  { %v2047_v58 = vpop.f32.mrb[6].mxu0  ;;  %v2432_v8 = vcombine.low %v1974_v24, %v2120_v22  ;;  %v2433_v61 = vcombine.high %v1974_v24, %v2120_v22  ;;  %v3048_v20 = vpop.f32.mrb[17].mxu1 }
 0x559   :  { %v2416_v60 = vcombine.low %v1901_v56, %v2047_v58  ;;  %v2417_v19 = vcombine.high %v1901_v56, %v2047_v58  ;;  %v3043_v62 = vpop.f32.mrb[7].mxu0 }
 0x55a   :  { %v2440_v0 = vrot.slane %v2432_v8, %v3277_v37  ;;  %v2447_v1 = vrot.slane %v2433_v61, %v3277_v37  ;;  %v2720_v8 = vld [vmem:[%s3692_s2 + $0x40] sm:$0xff]  ;;  %v2721_v61 = vld [vmem:[%s3692_s2 + $0x48] sm:$0xff] }
 0x55b   :  { %v2424_v46 = vrot.slane %v2416_v60, %v3277_v37  ;;  %v2431_v2 = vrot.slane %v2417_v19, %v3277_v37  ;;  %v3096_v20 = vpack.c.bf16 %v2721_v61, %v2720_v8 }
 0x55d   :  { %v2448_v4 = vcombine.low %v2424_v46, %v2440_v0  ;;  %v2449_v7 = vcombine.high %v2424_v46, %v2440_v0  ;;  %v2464_v33 = vcombine.low %v2431_v2, %v2447_v1  ;;  %v2465_v57 = vcombine.high %v2431_v2, %v2447_v1  ;;  %3097 = vmatprep.subr.bf16.mxu0 %v3096_v20 }
 0x55e   :  { %3099 = vmatpush3.bf16.msra.mxu0 %v3096_v20 }
 0x55f   :  { %v2456_v54 = vrot.slane %v2448_v4, %v3288_v45  ;;  %v2463_v10 = vrot.slane %v2449_v7, %v3288_v45  ;;  %v2472_v63 = vrot.slane %v2464_v33, %v3288_v45  ;;  %v2479_v5 = vrot.slane %v2465_v57, %v3288_v45  ;;  %v2722_v7 = vld [vmem:[%s3692_s2 + $0x50] sm:$0xff]  ;;  %v2723_v33 = vld [vmem:[%s3692_s2 + $0x58] sm:$0xff] }
 0x560   :  { %v3100_v57 = vpack.c.bf16 %v2723_v33, %v2722_v7 }
 0x561   :  { %v2552_v6 = vcombine.low %v2456_v54, %v2463_v10  ;;  %v2913_v11 = vcombine.high %v2456_v54, %v2463_v10  ;;  %v2568_v28 = vcombine.low %v2472_v63, %v2479_v5  ;;  %v2914_v29 = vcombine.high %v2472_v63, %v2479_v5 }
 0x562   :  { %3101 = vmatprep.subr.bf16.mxu0 %v3100_v57 }
 0x563   :  { %v2559_v12 = vrot.slane %v2552_v6, %v3277_v37  ;;  %v2567_v14 = vrot.slane %v2913_v11, %v3277_v37  ;;  %v2575_v15 = vrot.slane %v2568_v28, %v3277_v37  ;;  %v2583_v16 = vrot.slane %v2914_v29, %v3277_v37  ;;  %3103 = vmatpush3.bf16.msra.mxu0 %v3100_v57 }
 0x565   :  { %v2193_v18 = vpop.f32.mrb[8].mxu0  ;;  %v2266_v13 = vpop.f32.mrb[18].mxu1  ;;  %v2584_v21 = vcombine.low %v2559_v12, %v2567_v14  ;;  %v2600_v23 = vcombine.low %v2575_v15, %v2583_v16  ;;  %v2585_v39 = vcombine.high %v2559_v12, %v2567_v14  ;;  %v2601_v31 = vcombine.high %v2575_v15, %v2583_v16 }
 0x566   :  { %v3053_v32 = vpop.f32.mrb[9].mxu0  ;;  %v3058_v34 = vpop.f32.mrb[19].mxu1 }
 0x567   :  { %v3603_v35 = vrot.slane %v2584_v21, %v3288_v45  ;;  %v3606_v30 = vrot.slane %v2600_v23, %v3288_v45  ;;  %v2599_v36 = vrot.slane %v2585_v39, %v3288_v45  ;;  %v2615_v38 = vrot.slane %v2601_v31, %v3288_v45 }
 0x569   :  { %v2339_v40 = vpop.f32.mrb[10].mxu0  ;;  %v2412_v41 = vpop.f32.mrb[20].mxu1  ;;  %v2617_v42 = vcombine.high %v3603_v35, %v3606_v30  ;;  %v2618_v43 = vcombine.low %v2599_v36, %v2615_v38  ;;  %v2619_v47 = vcombine.high %v2599_v36, %v2615_v38  ;;  %v2616_v48 = vcombine.low %v3603_v35, %v3606_v30  ;;  %v2917_v35 = vld [vmem:[%s3692_s2 + $0x60] ss:$0 sm:$0xff]  ;;  %s3176_s2 = smov 32  }
 0x56a   :  { %v2484_v50 = vcombine.low %v2193_v18, %v2339_v40  ;;  %v2485_v26 = vcombine.high %v2193_v18, %v2339_v40  ;;  %v2500_v51 = vcombine.low %v2266_v13, %v2412_v41  ;;  %v2501_v49 = vcombine.high %v2266_v13, %v2412_v41  ;;  %v3063_v25 = vpop.f32.mrb[11].mxu0  ;;  %v3068_v53 = vpop.f32.mrb[21].mxu1 }
 0x56b   :  { %2690 = vrot.lane.b32.xlu0 %v2617_v42, %s3173_s1 }
 0x56c   :  { %v2492_v55 = vrot.slane %v2484_v50, %v3277_v37  ;;  %v2499_v27 = vrot.slane %v2485_v26, %v3277_v37  ;;  %v2508_v24 = vrot.slane %v2500_v51, %v3277_v37  ;;  %v2515_v56 = vrot.slane %v2501_v49, %v3277_v37 }
 0x56e   :  { %v2516_v59 = vcombine.low %v2492_v55, %v2508_v24  ;;  %v2517_v3 = vcombine.high %v2492_v55, %v2508_v24  ;;  %v2532_v22 = vcombine.low %v2499_v27, %v2515_v56  ;;  %v2533_v58 = vcombine.high %v2499_v27, %v2515_v56 }
 0x56f   :  { %2698 = vrot.lane.b32.xlu0 %v2618_v43, %s3174_s15  ;;  %v1831_v56 = vmul.f32 0.25, %v3577_v52 }
 0x570   :  { %v2524_v60 = vrot.slane %v2516_v59, %v3288_v45  ;;  %v2531_v19 = vrot.slane %v2517_v3, %v3288_v45  ;;  %v2540_v62 = vrot.slane %v2532_v22, %v3288_v45  ;;  %v2547_v0 = vrot.slane %v2533_v58, %v3288_v45 }
 0x571   :  { %v1830_v59 = vmul.f32 0.25, %v3570_v44 }
 0x572   :  { %v2620_v1 = vcombine.low %v2524_v60, %v2531_v19  ;;  %v2915_v46 = vcombine.high %v2524_v60, %v2531_v19  ;;  %v2636_v2 = vcombine.low %v2540_v62, %v2547_v0  ;;  %v2916_v4 = vcombine.high %v2540_v62, %v2547_v0 }
 0x573   :  { %2706 = vrot.lane.b32.xlu0 %v2619_v47, %s3175_s20 }
 0x574   :  { %v2627_v54 = vrot.slane %v2620_v1, %v3277_v37  ;;  %v2635_v10 = vrot.slane %v2915_v46, %v3277_v37  ;;  %v2643_v63 = vrot.slane %v2636_v2, %v3277_v37  ;;  %v2651_v5 = vrot.slane %v2916_v4, %v3277_v37 }
 0x576   :  { %v2652_v6 = vcombine.low %v2627_v54, %v2635_v10  ;;  %v2668_v11 = vcombine.low %v2643_v63, %v2651_v5  ;;  %v2653_v28 = vcombine.high %v2627_v54, %v2635_v10  ;;  %v2669_v29 = vcombine.high %v2643_v63, %v2651_v5 }
 0x578   :  { %v2660_v12 = vrot.slane %v2652_v6, %v3288_v45  ;;  %v2676_v14 = vrot.slane %v2668_v11, %v3288_v45  ;;  %v2667_v15 = vrot.slane %v2653_v28, %v3288_v45  ;;  %v2683_v16 = vrot.slane %v2669_v29, %v3288_v45 }
 0x57a   :  { %v2685_v18 = vcombine.high %v2660_v12, %v2676_v14  ;;  %v2686_v13 = vcombine.low %v2667_v15, %v2683_v16  ;;  %v2687_v21 = vcombine.high %v2667_v15, %v2683_v16  ;;  %v2684_v23 = vcombine.low %v2660_v12, %v2676_v14 }
 0x57c   :  { %2692 = vrot.lane.b32.xlu1 %v2685_v18, %s3173_s1 }
 0x580   :  { %2700 = vrot.lane.b32.xlu1 %v2686_v13, %s3174_s15 }
 0x584   :  { %2708 = vrot.lane.b32.xlu1 %v2687_v21, %s3175_s20 }
 0x5dd   :  { %v2691_v37 = vpop.permute.xlu0 %2690 }
 0x5de   :  { %v2712_v31 = vsel %vm1095_vm4, %v2616_v48, %v2691_v37 }
 0x5e1   :  { %v2699_v39 = vpop.permute.xlu0 %2698 }
 0x5e2   :  { %v2715_v45 = vsel %vm2714_vm5, %v2712_v31, %v2699_v39 }
 0x5e5   :  { %v2707_v32 = vpop.permute.xlu0 %2706 }
 0x5e6   :  { %v2718_v34 = vsel %vm2717_vm6, %v2715_v45, %v2707_v32 }
 0x5e7   :  { %3077 = vmatprep.mubr.msk.f32.mxu0 %vm2729_vm7, %v2718_v34 }
 0x5ee   :  { %v2693_v36 = vpop.permute.xlu1 %2692 }
 0x5ef   :  { %v2713_v40 = vsel %vm1095_vm4, %v2684_v23, %v2693_v36 }
 0x5f2   :  { %v2701_v38 = vpop.permute.xlu1 %2700 }
 0x5f3   :  { %v2716_v41 = vsel %vm2714_vm5, %v2713_v40, %v2701_v38 }
 0x5f6   :  { %v2709_v42 = vpop.permute.xlu1 %2708 }
 0x5f7   :  { %v2719_v43 = vsel %vm2717_vm6, %v2716_v41, %v2709_v42 }
 0x5f8   :  { %3078 = vmatmul.mubr.msk.f32.vlgmr.msra.gmra.mrb[12].mxu0 %vm2729_vm7, %v2719_v43 }
 0x6cb   :  { %v3079_v30 = vpop.f32.mrb[12].mxu0 }
 0x6cc   :  { %v2808_v47 = vadd.f32 %v3079_v30, %v2917_v35  ;;  %v2802_v48 = vpop.f32.mrb[13].mxu0 }
 0x6cd   :  { %v2803_v50 = vadd.f32 %v2917_v35, %v2802_v48 }
 0x6ce   :  { %v2921_v26 = vmul.f32 -1.442695, %v2808_v47  ;;  %2843 = vst.msk [vmem:[%s3694_s3 + $0x8] sm:$0xff] %vm2729_vm7, %v2808_v47 }
 0x6cf   :  { %v2920_v51 = vmul.f32 -1.442695, %v2803_v50  ;;  %2842 = vst.msk [vmem:[%s3694_s3] sm:$0xff] %vm2729_vm7, %v2803_v50 }
 0x6d0   :  { %3154 = vpow2.f32 %v2921_v26 }
 0x6d1   :  { %3156 = vpow2.f32 %v2920_v51 }
 0x6da   :  { %v3155_v49 = vpop.eup %3154 }
 0x6db   :  { %v3157_v25 = vpop.eup %3156  ;;  %v2819_v53 = vadd.f32 1.0, %v3155_v49 }
 0x6dc   :  { %v2818_v55 = vadd.f32 1.0, %v3157_v25 }
 0x6dd   :  { %3158 = vrcp.f32 %v2819_v53 }
 0x6de   :  { %3160 = vrcp.f32 %v2818_v55 }
 0x6e7   :  { %v3159_v27 = vpop.eup %3158 }
 0x6e8   :  { %v3161_v24 = vpop.eup %3160  ;;  %2828 = vrot.lane.b32.xlu1 %v3159_v27, %s3167_s7 }
 0x6e9   :  { %2826 = vrot.lane.b32.xlu0 %v3161_v24, %s3167_s7 }
 0x6ec   :  { %2836 = vrot.lane.b32.xlu1 %v2808_v47, %s3167_s7 }
 0x6ed   :  { %2834 = vrot.lane.b32.xlu0 %v2803_v50, %s3167_s7 }
 0x6f0   :  { %2848 = vrot.lane.b32.xlu1 %v1831_v56, %s3176_s2 }
 0x6f1   :  { %2846 = vrot.lane.b32.xlu0 %v1830_v59, %s3176_s2 }
 0x75a   :  { %v2829_v3 = vpop.permute.xlu1 %2828 }
 0x75b   :  { %v2827_v22 = vpop.permute.xlu0 %2826 }
 0x75e   :  { %v2837_v58 = vpop.permute.xlu1 %2836 }
 0x75f   :  { %v2835_v8 = vpop.permute.xlu0 %2834  ;;  %v2841_v61 = vsel %vm2811_vm8, %v2829_v3, %v2837_v58 }
 0x760   :  { %2859 = vrot.lane.b32.xlu1 %v2841_v61, %s3177_s27  ;;  %v2840_v20 = vsel %vm2811_vm8, %v2827_v22, %v2835_v8 }
 0x761   :  { %2857 = vrot.lane.b32.xlu0 %v2840_v20, %s3177_s27 }
 0x762   :  { %v2849_v60 = vpop.permute.xlu1 %2848 }
 0x763   :  { %2854 = vst.msk [vmem:[%s3694_s3 + $0x8] sm:$0xff] %vm2852_vm9, %v2849_v60  ;;  %v2847_v44 = vpop.permute.xlu0 %2846 }
 0x764   :  { %2853 = vst.msk [vmem:[%s3694_s3] sm:$0xff] %vm2852_vm9, %v2847_v44 }
 0x7d2   :  { %v2860_v17 = vpop.permute.xlu1 %2859 }
 0x7d3   :  { %2865 = vst.msk [vmem:[%s3694_s3 + $0x8] sm:$0xff] %vm2863_vm10, %v2860_v17  ;;  %v2858_v52 = vpop.permute.xlu0 %2857 }
 0x7d4   :  { %2868 = vst.msk [vmem:[%s3694_s3 + $0x8] sm:$0xff] %vm2866_vm11, %v3163_v9 }
 0x7d5   :  { %2864 = vst.msk [vmem:[%s3694_s3] sm:$0xff] %vm2863_vm10, %v2858_v52 }
 0x7d6   :  { %2867 = vst.msk [vmem:[%s3694_s3] sm:$0xff] %vm2866_vm11, %v3163_v9 }

</bundles_post_ra>
